<compile_context>
chip_gen: v6e
topology: v6e:2x2x1
jax: 0.10.0
libtpu: 0.0.40
codegen_flags: <defaults>
</compile_context>

<pallas_src>
import functools

import jax
import jax.numpy as jnp
from jax.experimental import pallas as pl
from jax.experimental.pallas import tpu as pltpu


def _channel_attention_kernel(x_ref, w1t_ref, w2t_ref, o_ref, acc_ref,
                              *, inv_hw, tb, thw, hw_total, has_tail):
    # x_ref: (TB, C, THW)   w1t_ref: (C, Cr)   w2t_ref: (Cr, C)
    # o_ref: (TB, 1, C)     acc_ref: (2*TB, C) f32 [rows 0:TB = avg, TB:2TB = max]
    hw_i = pl.program_id(1)
    c = acc_ref.shape[1]

    @pl.when(hw_i == 0)
    def _():
        acc_ref[0:tb, :] = jnp.zeros((tb, c), jnp.float32)
        acc_ref[tb:2 * tb, :] = jnp.full((tb, c), -jnp.inf, jnp.float32)

    x = x_ref[...].astype(jnp.float32)                       # (TB, C, THW)
    if has_tail:
        # Last HW block is partially out of range: mask sum with 0, max with -inf.
        remaining = hw_total - hw_i * thw
        lane = jax.lax.broadcasted_iota(jnp.int32, x.shape, 2)
        valid = lane < remaining
        x_sum = jnp.where(valid, x, 0.0)
        x_max = jnp.where(valid, x, -jnp.inf)
    else:
        x_sum = x
        x_max = x

    # Fold 1/HW into the partial sums -> rows 0:TB accumulate the spatial mean.
    acc_ref[0:tb, :] += jnp.sum(x_sum, axis=-1) * inv_hw
    acc_ref[tb:2 * tb, :] = jnp.maximum(acc_ref[tb:2 * tb, :],
                                        jnp.max(x_max, axis=-1))

    @pl.when(hw_i == pl.num_programs(1) - 1)
    def _():
        # Shared MLP on both pooled branches as one fused matmul per layer.
        p = acc_ref[...]                                               # (2*TB, C)
        h = jnp.dot(p, w1t_ref[...], preferred_element_type=jnp.float32)
        h = jnp.maximum(h, 0.0)                                        # ReLU
        y = jnp.dot(h, w2t_ref[...], preferred_element_type=jnp.float32)
        out = jax.nn.sigmoid(y[0:tb] + y[tb:2 * tb])                   # (TB, C)
        o_ref[...] = out[:, None, :].astype(o_ref.dtype)


def _largest_divisor_leq(n, cap):
    cap = int(max(1, min(n, cap)))
    for d in range(cap, 0, -1):
        if n % d == 0:
            return d
    return 1


def _choose_hw_tile(hw, c, itemsize, budget):
    """Pick the spatial tile. Full HW if it fits, else a multiple of 128."""
    if c * hw * itemsize <= budget:
        return hw
    per_col = max(1, c * itemsize)
    t = (budget // per_col) // 128 * 128
    t = max(128, t)                       # keep contiguous DMA runs >= 512 B
    t = min(t, ((hw + 127) // 128) * 128)
    return int(t)


def _choose_b_tile(b, c, thw, itemsize, budget, megacore):
    cap = max(1, budget // max(1, c * thw * itemsize))
    if megacore and b >= 2:
        # Only on multi-TensorCore chips: keep >= 2 steps on the parallel axis.
        cap = min(cap, max(1, b // 2))
    return _largest_divisor_leq(b, cap)


def _has_multiple_tensorcores():
    try:
        kind = str(getattr(jax.devices()[0], "device_kind", "")).lower()
        return any(tag in kind for tag in ("v4", "v5p", "v7", "7x"))
    except Exception:
        return False


def _vmem_capacity_bytes():
    try:
        return int(pltpu.get_tpu_info().vmem_capacity_bytes)
    except Exception:
        return 64 * 1024 * 1024     # conservative (v7x per-TC size)


def _channel_attention_xla(x, w1, w2):
    # Fused XLA path for tiny problems where grid/launch overhead dominates.
    avg = jnp.mean(x, axis=(2, 3))
    mx = jnp.max(x, axis=(2, 3))

    def fc(p):
        h = jnp.maximum(p @ w1.T, 0.0)
        return h @ w2.T

    out = jax.nn.sigmoid(fc(avg) + fc(mx))
    return out[:, :, None, None].astype(x.dtype)


def channel_attention(x, w1, w2, *,
                      block_budget_bytes=8 * 1024 * 1024,
                      allow_xla_fallback=True):
    """x: (B, C, H, W); w1: (Cr, C); w2: (C, Cr). Returns (B, C, 1, 1)."""
    B, C, H, W = x.shape
    Cr = w1.shape[0]
    HW = H * W
    itemsize = jnp.dtype(x.dtype).itemsize

    # Tiny problems: a fused XLA reduction + matmul beats any Pallas grid.
    if allow_xla_fallback and B * C * HW * itemsize < 256 * 1024:
        return _channel_attention_xla(x, w1, w2)

    x_flat = x.reshape(B, C, HW)
    megacore = _has_multiple_tensorcores()

    thw = _choose_hw_tile(HW, C, itemsize, block_budget_bytes)
    tb = _choose_b_tile(B, C, thw, itemsize, block_budget_bytes, megacore)
    n_hw = pl.cdiv(HW, thw)
    grid = (B // tb, n_hw)
    has_tail = (thw < HW) and (HW % thw != 0)

    # Pre-transpose + pre-cast the tiny weights once: kernel matmuls are plain
    # f32 (M,K)@(K,N) with no per-tile casts in the un-pipelined epilogue.
    w1_t = jnp.transpose(w1).astype(jnp.float32)   # (C, Cr)
    w2_t = jnp.transpose(w2).astype(jnp.float32)   # (Cr, C)

    # VMEM budget: double-buffered x blocks + weights + output + accumulator,
    # clamped below the physical per-TensorCore VMEM (64 MiB on v7x).
    block_bytes = tb * C * thw * itemsize
    need = (2 * block_bytes
            + 2 * (C * Cr * 4) * 2
            + 2 * (tb * C * itemsize)
            + 2 * tb * C * 4
            + (4 << 20))
    ceiling = max(24 << 20, _vmem_capacity_bytes() - (8 << 20))
    vmem_limit = int(min(ceiling, max(32 << 20, need)))

    kernel = functools.partial(_channel_attention_kernel,
                               inv_hw=float(1.0 / HW), tb=tb, thw=thw,
                               hw_total=HW, has_tail=has_tail)

    out = pl.pallas_call(
        kernel,
        out_shape=jax.ShapeDtypeStruct((B, 1, C), x.dtype),
        grid_spec=pltpu.PrefetchScalarGridSpec(
            num_scalar_prefetch=0,
            grid=grid,
            in_specs=[
                pl.BlockSpec((tb, C, thw), lambda b, h: (b, 0, h)),
                pl.BlockSpec((C, Cr), lambda b, h: (0, 0)),
                pl.BlockSpec((Cr, C), lambda b, h: (0, 0)),
            ],
            out_specs=pl.BlockSpec((tb, 1, C), lambda b, h: (b, 0, 0)),
            scratch_shapes=[
                pltpu.VMEM((2 * tb, C), jnp.float32),   # [avg ; max] accumulator
            ],
        ),
        compiler_params=pltpu.CompilerParams(
            dimension_semantics=("parallel", "arbitrary"),
            vmem_limit_bytes=vmem_limit,
        ),
    )(x_flat, w1_t, w2_t)

    return out.reshape(B, C, 1, 1)


def _reference(x, w1, w2):
    avg = jnp.mean(x, axis=(2, 3))                      # (B, C)
    mx = jnp.max(x, axis=(2, 3))                        # (B, C)

    def fc(p):
        h = jnp.maximum(p @ w1.T, 0.0)                  # (B, Cr)
        return h @ w2.T                                 # (B, C)

    out = jax.nn.sigmoid(fc(avg) + fc(mx))
    return out[:, :, None, None]


if __name__ == "__main__":
    key = jax.random.PRNGKey(0)

    # Test 1: PyTorch-module defaults (reduction_ratio=16), Pallas path forced.
    B, C, H, W = 2, 32, 16, 16
    Cr = C // 16                                        # = 2
    kx, k1, k2 = jax.random.split(key, 3)
    x = jax.random.normal(kx, (B, C, H, W), dtype=jnp.float32)
    w1 = jax.random.normal(k1, (Cr, C), dtype=jnp.float32) * 0.1   # Conv2d(C, Cr, 1)
    w2 = jax.random.normal(k2, (C, Cr), dtype=jnp.float32) * 0.1   # Conv2d(Cr, C, 1)

    out = jax.block_until_ready(channel_attention(x, w1, w2,
                                                  allow_xla_fallback=False))
    ref = _reference(x, w1, w2)
    assert out.shape == (B, C, 1, 1)
    assert jnp.allclose(out, ref, atol=1e-5, rtol=1e-5)

    # Test 2: non-128-divisible HW with forced spatial tiling (tail masking),
    # all-negative inputs so a wrong max-pad (0 instead of -inf) would show.
    B2, C2, H2, W2, Cr2 = 2, 16, 13, 11, 4              # HW = 143
    k3, k4, k5 = jax.random.split(jax.random.PRNGKey(1), 3)
    x2 = -jnp.abs(jax.random.normal(k3, (B2, C2, H2, W2), dtype=jnp.float32)) - 0.5
    w1b = jax.random.normal(k4, (Cr2, C2), dtype=jnp.float32) * 0.1
    w2b = jax.random.normal(k5, (C2, Cr2), dtype=jnp.float32) * 0.1
    out2 = jax.block_until_ready(
        channel_attention(x2, w1b, w2b,
                          block_budget_bytes=8 * 1024,     # tiny budget -> thw=128, tail=15
                          allow_xla_fallback=False))
    ref2 = _reference(x2, w1b, w2b)
    assert out2.shape == (B2, C2, 1, 1)
    assert jnp.allclose(out2, ref2, atol=1e-5, rtol=1e-5)

    # Test 3: small-problem XLA fallback path agrees with the reference too.
    out3 = jax.block_until_ready(channel_attention(x, w1, w2))
    assert jnp.allclose(out3, ref, atol=1e-5, rtol=1e-5)

    print("KERNEL_OK")
</pallas_src>

<mosaic_0001>
module attributes {stable_mosaic.version = 11 : i64} {
  func.func @_channel_attention_kernel(%arg0: i32, %arg1: i32, %arg2: memref<2x32x256xf32, #tpu.memory_space<vmem>>, %arg3: memref<32x2xf32, #tpu.memory_space<vmem>>, %arg4: memref<2x32xf32, #tpu.memory_space<vmem>>, %arg5: memref<2x1x32xf32, #tpu.memory_space<vmem>>, %arg6: memref<4x32xf32, #tpu.memory_space<vmem>>) attributes {dimension_semantics = [#tpu.dimension_semantics<parallel>, #tpu.dimension_semantics<arbitrary>], iteration_bounds = array<i64: 1, 1>, scalar_prefetch = 0 : i64, scratch_operands = 1 : i64, tpu.core_type = #tpu.core_type<tc>, window_params = [{transform_indices = @transform_0, window_bounds = array<i64: 2, 32, 256>}, {pipeline_mode = #tpu.pipeline_mode<synchronous>, transform_indices = @transform_1, window_bounds = array<i64: 32, 2>}, {pipeline_mode = #tpu.pipeline_mode<synchronous>, transform_indices = @transform_2, window_bounds = array<i64: 2, 32>}, {transform_indices = @transform_3, window_bounds = array<i64: 2, 1, 32>}]} {
    %c0_i32 = arith.constant 0 : i32
    %0 = arith.cmpi eq, %arg1, %c0_i32 : i32
    %1 = arith.extui %0 : i1 to i32
    %c0_i32_0 = arith.constant 0 : i32
    %2 = arith.cmpi ne, %1, %c0_i32_0 : i32
    scf.if %2 {
      %cst_14 = arith.constant 0.000000e+00 : f32
      %17 = vector.broadcast %cst_14 : f32 to vector<2x32xf32>
      %c0_15 = arith.constant 0 : index
      %c0_16 = arith.constant 0 : index
      %18 = vector.load %arg6[%c0_15, %c0_16] : memref<4x32xf32, #tpu.memory_space<vmem>>, vector<2x32xf32>
      tpu.vector_store %arg6[%c0_15, %c0_16], %17 {strides = array<i32>} : memref<4x32xf32, #tpu.memory_space<vmem>>, vector<2x32xf32>,
      %cst_17 = arith.constant 0xFF800000 : f32
      %19 = vector.broadcast %cst_17 : f32 to vector<2x32xf32>
      %c2_18 = arith.constant 2 : index
      %c0_19 = arith.constant 0 : index
      %20 = vector.load %arg6[%c2_18, %c0_19] : memref<4x32xf32, #tpu.memory_space<vmem>>, vector<2x32xf32>
      tpu.vector_store %arg6[%c2_18, %c0_19], %19 {strides = array<i32>} : memref<4x32xf32, #tpu.memory_space<vmem>>, vector<2x32xf32>,
    } else {
    }
    %c0 = arith.constant 0 : index
    %c0_1 = arith.constant 0 : index
    %c0_2 = arith.constant 0 : index
    %3 = vector.load %arg2[%c0, %c0_1, %c0_2] : memref<2x32x256xf32, #tpu.memory_space<vmem>>, vector<2x32x256xf32>
    %c0_3 = arith.constant 0 : index
    %c0_4 = arith.constant 0 : index
    %4 = vector.load %arg6[%c0_3, %c0_4] : memref<4x32xf32, #tpu.memory_space<vmem>>, vector<2x32xf32>
    %cst = arith.constant dense<0.000000e+00> : vector<2x32xf32>
    %5 = vector.multi_reduction <add>, %3, %cst [2] : vector<2x32x256xf32> to vector<2x32xf32>
    %cst_5 = arith.constant 3.906250e-03 : f32
    %6 = vector.broadcast %cst_5 : f32 to vector<2x32xf32>
    %7 = arith.mulf %5, %6 : vector<2x32xf32>
    %8 = arith.addf %4, %7 : vector<2x32xf32>
    %c0_6 = arith.constant 0 : index
    %c0_7 = arith.constant 0 : index
    %9 = vector.load %arg6[%c0_6, %c0_7] : memref<4x32xf32, #tpu.memory_space<vmem>>, vector<2x32xf32>
    tpu.vector_store %arg6[%c0_6, %c0_7], %8 {strides = array<i32>} : memref<4x32xf32, #tpu.memory_space<vmem>>, vector<2x32xf32>,
    %c2 = arith.constant 2 : index
    %c0_8 = arith.constant 0 : index
    %10 = vector.load %arg6[%c2, %c0_8] : memref<4x32xf32, #tpu.memory_space<vmem>>, vector<2x32xf32>
    %cst_9 = arith.constant dense<0xFF800000> : vector<2x32xf32>
    %11 = vector.multi_reduction <maximumf>, %3, %cst_9 [2] : vector<2x32x256xf32> to vector<2x32xf32>
    %12 = arith.maximumf %10, %11 : vector<2x32xf32>
    %c2_10 = arith.constant 2 : index
    %c0_11 = arith.constant 0 : index
    %13 = vector.load %arg6[%c2_10, %c0_11] : memref<4x32xf32, #tpu.memory_space<vmem>>, vector<2x32xf32>
    tpu.vector_store %arg6[%c2_10, %c0_11], %12 {strides = array<i32>} : memref<4x32xf32, #tpu.memory_space<vmem>>, vector<2x32xf32>,
    %c0_i32_12 = arith.constant 0 : i32
    %14 = arith.cmpi eq, %arg1, %c0_i32_12 : i32
    %15 = arith.extui %14 : i1 to i32
    %c0_i32_13 = arith.constant 0 : i32
    %16 = arith.cmpi ne, %15, %c0_i32_13 : i32
    scf.if %16 {
      %c0_14 = arith.constant 0 : index
      %c0_15 = arith.constant 0 : index
      %17 = vector.load %arg6[%c0_14, %c0_15] : memref<4x32xf32, #tpu.memory_space<vmem>>, vector<4x32xf32>
      %c0_16 = arith.constant 0 : index
      %c0_17 = arith.constant 0 : index
      %18 = vector.load %arg3[%c0_16, %c0_17] : memref<32x2xf32, #tpu.memory_space<vmem>>, vector<32x2xf32>
      %cst_18 = arith.constant dense<0.000000e+00> : vector<4x2xf32>
      %19 = tpu.matmul %17, %18, %cst_18 {dimension_numbers = #tpu.dot_dimension_numbers<[1], [0], [0], [1], [0, 0, 1, 1], [], []>} : vector<4x32xf32>, vector<32x2xf32>, vector<4x2xf32> -> vector<4x2xf32>
      %cst_19 = arith.constant 0.000000e+00 : f32
      %20 = vector.broadcast %cst_19 : f32 to vector<4x2xf32>
      %21 = arith.maximumf %19, %20 : vector<4x2xf32>
      %c0_20 = arith.constant 0 : index
      %c0_21 = arith.constant 0 : index
      %22 = vector.load %arg4[%c0_20, %c0_21] : memref<2x32xf32, #tpu.memory_space<vmem>>, vector<2x32xf32>
      %cst_22 = arith.constant dense<0.000000e+00> : vector<4x32xf32>
      %23 = tpu.matmul %21, %22, %cst_22 {dimension_numbers = #tpu.dot_dimension_numbers<[1], [0], [0], [1], [0, 0, 1, 1], [], []>} : vector<4x2xf32>, vector<2x32xf32>, vector<4x32xf32> -> vector<4x32xf32>
      %24 = vector.extract_strided_slice %23 {offsets = [0, 0], sizes = [2, 32], strides = [1, 1]} : vector<4x32xf32> to vector<2x32xf32>
      %25 = vector.extract_strided_slice %23 {offsets = [2, 0], sizes = [2, 32], strides = [1, 1]} : vector<4x32xf32> to vector<2x32xf32>
      %26 = arith.addf %24, %25 : vector<2x32xf32>
      %27 = arith.negf %26 : vector<2x32xf32>
      %28 = math.exp %27 : vector<2x32xf32>
      %cst_23 = arith.constant 1.000000e+00 : f32
      %29 = vector.broadcast %cst_23 : f32 to vector<2x32xf32>
      %30 = arith.addf %29, %28 : vector<2x32xf32>
      %31 = arith.divf %29, %30 : vector<2x32xf32>
      %32 = vector.shape_cast %31 : vector<2x32xf32> to vector<2x1x32xf32>
      %c0_24 = arith.constant 0 : index
      %c0_25 = arith.constant 0 : index
      %c0_26 = arith.constant 0 : index
      %33 = vector.load %arg5[%c0_24, %c0_25, %c0_26] : memref<2x1x32xf32, #tpu.memory_space<vmem>>, vector<2x1x32xf32>
      tpu.vector_store %arg5[%c0_24, %c0_25, %c0_26], %32 {strides = array<i32>} : memref<2x1x32xf32, #tpu.memory_space<vmem>>, vector<2x1x32xf32>,
    } else {
    }
    return
  }
  func.func @transform_0(%arg0: i32, %arg1: i32) -> (i32, i32, i32) {
    %c0_i32 = arith.constant 0 : i32
    %c0_i32_0 = arith.constant 0 : i32
    return %arg0, %c0_i32, %arg1 : i32, i32, i32
  }
  func.func @transform_1(%arg0: i32, %arg1: i32) -> (i32, i32) {
    %c0_i32 = arith.constant 0 : i32
    %c0_i32_0 = arith.constant 0 : i32
    %c0_i32_1 = arith.constant 0 : i32
    return %c0_i32, %c0_i32_0 : i32, i32
  }
  func.func @transform_2(%arg0: i32, %arg1: i32) -> (i32, i32) {
    %c0_i32 = arith.constant 0 : i32
    %c0_i32_0 = arith.constant 0 : i32
    %c0_i32_1 = arith.constant 0 : i32
    return %c0_i32, %c0_i32_0 : i32, i32
  }
  func.func @transform_3(%arg0: i32, %arg1: i32) -> (i32, i32, i32) {
    %c0_i32 = arith.constant 0 : i32
    %c0_i32_0 = arith.constant 0 : i32
    %c0_i32_1 = arith.constant 0 : i32
    return %arg0, %c0_i32, %c0_i32_0 : i32, i32, i32
  }
}

</mosaic_0001>

<bundles_post_ra>
// kernel: tpu_custom_call.1
= control target key start
LH: loop header
LB: loop body
LE: loop exit
PB: predicated region body
PF: predicated region fallthrough
CT: control target
= control target key end

     0   :  { %8 = vsyncpa [#allocation4], 0  ;;  %s599_s0 = inlined_call_operand.hbm [shape: f32[2,32,256], index: 0, kind: input, shape index: {}]   ;;  %s600_s1 = inlined_call_operand.vmem [shape: f32[32,2], index: 1, kind: input, shape index: {}]   ;;  %s601_s2 = inlined_call_operand.vmem [shape: f32[2,32], index: 2, kind: input, shape index: {}]   ;;  %s602_s3 = inlined_call_operand.hbm [shape: f32[2,1,32], index: 3, kind: output, shape index: {}]  }
   0x1   :  { %9 = vsyncpa [#allocation5], 0  ;;  %s521_s12 = smov [#allocation3]  }
   0x2   :  { %s15_s13 = sshll.u32 %s521_s12, 4  ;;  %s16_s13 = int_to_ptr.vmem [resolvable:$true] %s15_s13 }
   0x3   :  { %s485_s14 = scalar_lea.vmem %s16_s13, 2048  ;;  %p490_p1 = scmp.lt.s32.totalorder %s16_s13, %s16_s13 }
   0x4   :  { %p486_p0 = scmp.ne.s32.totalorder %s16_s13, %s485_s14  ;;  %p491_p2 = scmp.lt.s32.totalorder %s485_s14, %s485_s14 }
   0x6   :  { %p492_p3 = por %p491_p2, %p490_p1 }
   0x8   :  { %p493_p4 = pnand %p492_p3, %p486_p0 }
   0xa   :  { %496 = shalt.err (!%p493_p4)
}
   0xb   :  { %s522_s15 = smov 256   ;;  %s523_s16 = smov 16  }
   0xc   :  { %21 = dma.hbm_to_vmem [thread:$0]  %s599_s0, 2048, %s16_s13, [#allocation4], %s522_s15, %s522_s15, %s523_s16  }
   0xd   :  { %517 = dma.done.wait [#allocation4], 2048  }
   0xe   :  { %518 = vsyncadd [#allocation4], 4294965248  ;;  %v44_v0 = vld [vmem:[#allocation3 + $0x40] sm:$0xff]  ;;  %v45_v1 = vld [vmem:[#allocation3 + $0x48] sm:$0xff]  ;;  %vm33_vm0 = vcmask 254976   ;;  %v524_v30 = vmov 0.0   ;;  %v93_v38 = vlaneseq }
   0xf   :  { %v36_v2 = vld [vmem:[#allocation3] sm:$0xff]  ;;  %v65_v3 = vadd.f32 %v45_v1, %v44_v0  ;;  %v37_v4 = vld [vmem:[#allocation3 + $0x8] sm:$0xff]  ;;  %v46_v5 = vld [vmem:[#allocation3 + $0x50] sm:$0xff]  ;;  %v158_v27 = vmax.f32 %v44_v0, %v45_v1  ;;  %34 = vst.msk [vmem:[#allocation2] sm:$0x3] %vm33_vm0, %v524_v30  ;;  %448 = vmatprep.subr.mxu0 %v524_v30  ;;  %459 = vmatprep.subr.mxu1 %v524_v30  ;;  %v525_v33 = vmov -inf  }
  0x10   :  { %v47_v6 = vld [vmem:[#allocation3 + $0x58] sm:$0xff]  ;;  %v53_v7 = vadd.f32 %v37_v4, %v36_v2  ;;  %v38_v8 = vld [vmem:[#allocation3 + $0x10] sm:$0xff]  ;;  %v48_v12 = vld [vmem:[#allocation3 + $0x60] sm:$0xff]  ;;  %v146_v25 = vmax.f32 %v36_v2, %v37_v4  ;;  %35 = vst.msk [vmem:[#allocation2 + $0x2] sm:$0x3] %vm33_vm0, %v525_v33  ;;  %vm526_vm1 = vmmov 0  }
  0x11   :  { %v39_v9 = vld [vmem:[#allocation3 + $0x18] sm:$0xff]  ;;  %66 = vadd.xlane.f32.xlu1 %v65_v3  ;;  %v68_v10 = vadd.f32 %v47_v6, %v46_v5  ;;  %v49_v13 = vld [vmem:[#allocation3 + $0x68] sm:$0xff]  ;;  %v40_v14 = vld [vmem:[#allocation3 + $0x20] sm:$0xff]  ;;  %v161_v26 = vmax.f32 %v46_v5, %v47_v6  ;;  %456 = vmatprep.mubr.msk.f32.mxu0 %vm526_vm1, %v524_v30  ;;  %v94_v40 = vand.u32 127, %v93_v38  ;;  %v568_v45 = vshrl.u32 %v93_v38, 7 }
  0x12   :  { %54 = vadd.xlane.f32.xlu0 %v53_v7  ;;  %v56_v11 = vadd.f32 %v39_v9, %v38_v8  ;;  %v41_v15 = vld [vmem:[#allocation3 + $0x28] sm:$0xff]  ;;  %v71_v16 = vadd.f32 %v49_v13, %v48_v12  ;;  %v50_v18 = vld [vmem:[#allocation3 + $0x70] sm:$0xff]  ;;  %v51_v19 = vld [vmem:[#allocation3 + $0x78] sm:$0xff]  ;;  %v149_v24 = vmax.f32 %v38_v8, %v39_v9  ;;  %v164_v28 = vmax.f32 %v48_v12, %v49_v13 }
  0x13   :  { %v59_v17 = vadd.f32 %v41_v15, %v40_v14  ;;  %v42_v20 = vld [vmem:[#allocation3 + $0x30] sm:$0xff]  ;;  %v43_v21 = vld [vmem:[#allocation3 + $0x38] sm:$0xff]  ;;  %v74_v22 = vadd.f32 %v51_v19, %v50_v18  ;;  %v152_v29 = vmax.f32 %v40_v14, %v41_v15  ;;  %v167_v31 = vmax.f32 %v50_v18, %v51_v19  ;;  %v225_v36 = vld [vmem:[%s600_s1 + $0x8] sm:$0xff]  ;;  %461 = vmatprep.mubr.msk.f32.mxu1 %vm526_vm1, %v524_v30 }
  0x14   :  { %v62_v23 = vadd.f32 %v43_v21, %v42_v20  ;;  %v155_v32 = vmax.f32 %v42_v20, %v43_v21  ;;  %v227_v34 = vld [vmem:[%s600_s1 + $0x18] sm:$0xff]  ;;  %v226_v35 = vld [vmem:[%s600_s1 + $0x10] sm:$0xff]  ;;  %v224_v37 = vld [vmem:[%s600_s1] sm:$0xff]  ;;  %v99_v42 = vadd.s32 4294967288, %v94_v40  ;;  %v106_v44 = vadd.s32 4294967280, %v94_v40 }
  0x15   :  { %69 = vadd.xlane.f32.xlu1 %v68_v10  ;;  %449 = vmatpush3.msra.mxu0 %v227_v34  ;;  %v113_v49 = vadd.s32 4294967272, %v94_v40  ;;  %v97_v53 = vsub.s32 %v94_v40, %v568_v45  ;;  %vm104_vm2 = vcmask 130112   ;;  %vm111_vm3 = vcmask 195712  }
  0x16   :  { %57 = vadd.xlane.f32.xlu0 %v56_v11  ;;  %450 = vmatprep.subr.mxu0 %v524_v30  ;;  %v102_v47 = vsub.s32 %v99_v42, %v568_v45  ;;  %v109_v51 = vsub.s32 %v106_v44, %v568_v45  ;;  %vm118_vm4 = vcmask 261312   ;;  %vm139_vm5 = vcmask 1041409   ;;  %v52_v14 = vld [vmem:[#allocation2] sm:$0x3] }
  0x17   :  { %451 = vmatpush3.msra.mxu0 %v226_v35  ;;  %v116_v60 = vsub.s32 %v113_v49, %v568_v45  ;;  %v145_v38 = vld [vmem:[#allocation2 + $0x2] sm:$0x3]  ;;  %vm228_vm6 = vcmask 261120   ;;  %vm308_vm7 = vcmask 1041408   ;;  %vm304_vm8 = vcmask 15360  }
  0x18   :  { %452 = vmatprep.subr.mxu0 %v524_v30  ;;  %vm417_vm9 = vcmask 253952  }
  0x19   :  { %72 = vadd.xlane.f32.xlu1 %v71_v16  ;;  %453 = vmatpush3.msra.mxu0 %v225_v36 }
  0x1a   :  { %60 = vadd.xlane.f32.xlu0 %v59_v17  ;;  %454 = vmatprep.subr.mxu0 %v524_v30 }
  0x1b   :  { %455 = vmatpush3.msra.mxu0 %v224_v37 }
  0x1d   :  { %75 = vadd.xlane.f32.xlu1 %v74_v22 }
  0x1e   :  { %63 = vadd.xlane.f32.xlu0 %v62_v23 }
  0x21   :  { %150 = vmax.xlane.f32.xlu1 %v149_v24 }
  0x22   :  { %147 = vmax.xlane.f32.xlu0 %v146_v25 }
  0x25   :  { %162 = vmax.xlane.f32.xlu1 %v161_v26 }
  0x26   :  { %159 = vmax.xlane.f32.xlu0 %v158_v27 }
  0x29   :  { %165 = vmax.xlane.f32.xlu1 %v164_v28 }
  0x2a   :  { %153 = vmax.xlane.f32.xlu0 %v152_v29 }
  0x2d   :  { %168 = vmax.xlane.f32.xlu1 %v167_v31 }
  0x2e   :  { %156 = vmax.xlane.f32.xlu0 %v155_v32 }
  0x9a   :  { %v67_v39 = vpop.xlane.xlu1 %66 }
  0x9b   :  { %v55_v41 = vpop.xlane.xlu0 %54  ;;  %v81_v54 = vmul.f32 0.00390625, %v67_v39 }
  0x9c   :  { %v77_v57 = vmul.f32 0.00390625, %v55_v41 }
  0x9d   :  { %v123_v0 = vrot.slane %v81_v54, %v97_v53 }
  0x9e   :  { %v70_v43 = vpop.xlane.xlu1 %69  ;;  %v98_v4 = vrot.slane %v77_v57, %v97_v53 }
  0x9f   :  { %v58_v46 = vpop.xlane.xlu0 %57  ;;  %v82_v48 = vmul.f32 0.00390625, %v70_v43  ;;  %v303_v43 = vld [vmem:[%s601_s2] sm:$0x3]  ;;  %s528_s2 = smov [#allocation6]  }
  0xa0   :  { %v78_v50 = vmul.f32 0.00390625, %v58_v46  ;;  %460 = vmatpush3.msk.msra.mxu1 %vm308_vm7, %v303_v43  ;;  %s425_s27 = sshll.u32 %s528_s2, 4  ;;  %s426_s27 = int_to_ptr.vmem [resolvable:$true] %s425_s27 }
  0xa1   :  { %v127_v59 = vrot.slane %v82_v48, %v102_v47  ;;  %s497_s28 = scalar_lea.vmem %s426_s27, 32  ;;  %p502_p6 = scmp.lt.s32.totalorder %s426_s27, %s426_s27 }
  0xa2   :  { %v73_v52 = vpop.xlane.xlu1 %72  ;;  %v103_v61 = vrot.slane %v78_v50, %v102_v47  ;;  %p498_p5 = scmp.ne.s32.totalorder %s426_s27, %s497_s28  ;;  %p503_p7 = scmp.lt.s32.totalorder %s497_s28, %s497_s28 }
  0xa3   :  { %v83_v55 = vmul.f32 0.00390625, %v73_v52  ;;  %v61_v56 = vpop.xlane.xlu0 %60  ;;  %v128_v6 = vsel %vm104_vm2, %v127_v59, %v123_v0 }
  0xa4   :  { %v79_v58 = vmul.f32 0.00390625, %v61_v56  ;;  %v105_v8 = vsel %vm104_vm2, %v103_v61, %v98_v4  ;;  %p504_p8 = por %p503_p7, %p502_p6 }
  0xa5   :  { %v132_v62 = vrot.slane %v83_v55, %v109_v51  ;;  %v527_v55 = vmov 1966171168  }
  0xa6   :  { %v76_v63 = vpop.xlane.xlu1 %75  ;;  %v110_v1 = vrot.slane %v79_v58, %v109_v51  ;;  %v394_v56 = vunpack.c.l.s4 %v527_v55  ;;  %p505_p9 = pnand %p504_p8, %p498_p5 }
  0xa7   :  { %v84_v2 = vmul.f32 0.00390625, %v76_v63  ;;  %v64_v3 = vpop.xlane.xlu0 %63  ;;  %v133_v9 = vsel %vm111_vm3, %v132_v62, %v128_v6 }
  0xa8   :  { %v80_v5 = vmul.f32 0.00390625, %v64_v3  ;;  %v112_v12 = vsel %vm111_vm3, %v110_v1, %v105_v8  ;;  %v395_v57 = vunpack.c.0.s8 %v394_v56 }
  0xa9   :  { %v137_v7 = vrot.slane %v84_v2, %v116_v60 }
  0xaa   :  { %v117_v10 = vrot.slane %v80_v5, %v116_v60  ;;  %v151_v11 = vpop.xlane.xlu1 %150  ;;  %v398_v58 = vsub.s32 %v395_v57, %v568_v45 }
  0xab   :  { %v138_v13 = vsel %vm118_vm4, %v137_v7, %v133_v9  ;;  %v148_v15 = vpop.xlane.xlu0 %147  ;;  %v185_v25 = vrot.slane %v151_v11, %v102_v47 }
  0xac   :  { %v119_v16 = vsel %vm118_vm4, %v117_v10, %v112_v12  ;;  %v181_v26 = vrot.slane %v148_v15, %v97_v53 }
  0xad   :  { %v140_v17 = vsel %vm139_vm5, %v138_v13, %v119_v16 }
  0xae   :  { %v142_v18 = vadd.f32 %v140_v17, %v52_v14  ;;  %v163_v19 = vpop.xlane.xlu1 %162  ;;  %v186_v33 = vsel %vm104_vm2, %v185_v25, %v181_v26 }
  0xaf   :  { %v160_v20 = vpop.xlane.xlu0 %159  ;;  %v204_v22 = vrot.slane %v163_v19, %v102_v47 }
  0xb0   :  { %144 = vst.msk [vmem:[#allocation2] sm:$0x3] %vm33_vm0, %v142_v18  ;;  %v200_v23 = vrot.slane %v160_v20, %v97_v53 }
  0xb2   :  { %v166_v21 = vpop.xlane.xlu1 %165  ;;  %v205_v30 = vsel %vm104_vm2, %v204_v22, %v200_v23 }
  0xb3   :  { %v154_v24 = vpop.xlane.xlu0 %153  ;;  %v209_v27 = vrot.slane %v166_v21, %v109_v51 }
  0xb4   :  { %v190_v28 = vrot.slane %v154_v24, %v109_v51 }
  0xb5   :  { %v210_v34 = vsel %vm111_vm3, %v209_v27, %v205_v30 }
  0xb6   :  { %v169_v29 = vpop.xlane.xlu1 %168  ;;  %v191_v36 = vsel %vm111_vm3, %v190_v28, %v186_v33 }
  0xb7   :  { %v214_v31 = vrot.slane %v169_v29, %v116_v60  ;;  %v157_v32 = vpop.xlane.xlu0 %156 }
  0xb8   :  { %v195_v35 = vrot.slane %v157_v32, %v116_v60 }
  0xb9   :  { %v215_v37 = vsel %vm118_vm4, %v214_v31, %v210_v34 }
  0xba   :  { %v196_v39 = vsel %vm118_vm4, %v195_v35, %v191_v36 }
  0xbb   :  { %v216_v40 = vsel %vm139_vm5, %v215_v37, %v196_v39 }
  0xbc   :  { %v218_v41 = vmax.f32 %v145_v38, %v216_v40 }
  0xbe   :  { %219 = vst.msk [vmem:[#allocation2 + $0x2] sm:$0x3] %vm33_vm0, %v218_v41 }
  0xc5   :  { %v223_v42 = vld [vmem:[#allocation2] sm:$0xf] }
  0xc6   :  { %457 = vmatmul.mubr.msk.f32.vlgmr.msra.gmra.mxu0 %vm228_vm6, %v223_v42 }
 0x186   :  { %v298_v44 = vpop.f32.mrf.mxu0 }
 0x187   :  { %v302_v46 = vmax.f32 %v298_v44, 0.0 }
 0x188   :  { %v458_v47 = vpop.f32.mrf.mxu0 }
 0x189   :  { %462 = vmatmul.mubr.msk.f32.vlgmr.msra.gmra.mxu1 %vm304_vm8, %v302_v46 }
 0x249   :  { %v378_v48 = vpop.f32.mrf.mxu1 }
 0x24a   :  { %v383_v49 = vrot.slane %v378_v48, 2 }
 0x24b   :  { %v463_v50 = vpop.f32.mrf.mxu1 }
 0x24c   :  { %v385_v51 = vadd.f32 %v383_v49, %v378_v48 }
 0x24e   :  { %v440_v52 = vmul.f32 -1.442695, %v385_v51 }
 0x250   :  { %473 = vpow2.f32 %v440_v52 }
 0x25d   :  { %v474_v53 = vpop.eup %473 }
 0x25e   :  { %v389_v54 = vadd.f32 1.0, %v474_v53 }
 0x260   :  { %475 = vrcp.f32 %v389_v54 }
 0x26d   :  { %v476_v59 = vpop.eup %475 }
 0x26e   :  { %v399_v60 = vrot.slane %v476_v59, %v398_v58 }
 0x270   :  { %v400_v61 = vcombine.high %v399_v60, %v399_v60  ;;  %v407_v62 = vrot.slane %v399_v60, %v398_v58 }
 0x272   :  { %v414_v63 = vrot.slane %v400_v61, %v398_v58  ;;  %418 = vst.msk [vmem:[#allocation6] sm:$0x1] %vm417_vm9, %v407_v62 }
 0x274   :  { %419 = vst.msk [vmem:[#allocation6 + $0x1] sm:$0x1] %vm417_vm9, %v414_v63 }
 0x275   :  { %508 = shalt.err (!%p505_p9)
}
 0x276   :  { %s529_s29 = smov 1  }
 0x277   :  { %431 = dma.vmem_to_hbm [thread:$0]  %s426_s27, 32, %s602_s3, [#allocation5], %s523_s16, %s523_s16, %s529_s29  }
 0x278   :  { %519 = dma.done.wait [#allocation5], 32  }
 0x279   :  { %520 = vsyncadd [#allocation5], 4294967264 }
 0x27a   :  { %435 = vsyncpa [#allocation4], 1 }
 0x27b   :  { %436 = vsyncpa [#allocation5], 1 }

</bundles_post_ra>
